<compile_context>
chip_gen: v7x
topology: tpu7x:2x2x1
jax: 0.10.0
libtpu: 0.0.40
codegen_flags: <defaults>
</compile_context>

<pallas_src>
import math

import jax
import jax.numpy as jnp
from jax.experimental import pallas as pl
from jax.experimental.pallas import tpu as pltpu

D_PAD = 128     # lane-dense padded node-feature width used by every layer
_SUB = 16       # row padding granularity (bf16 packs two rows per sublane)


def _round_up(n, m):
    return ((n + m - 1) // m) * m


def _pad2d(a, rows, cols, dtype):
    out = jnp.zeros((rows, cols), dtype)
    return out.at[: a.shape[0], : a.shape[1]].set(a.astype(dtype))


# ---------------------------------------------------------------------------
# Fused Pallas kernel: the full MessagePassing stack in a single pallas_call.
# grid = (num_layers,) ["arbitrary"]; node features persist in VMEM scratch
# across layers; per-layer weights are streamed via BlockSpec on the layer axis.
# ---------------------------------------------------------------------------
def _fused_mp_kernel(x_hbm_ref, attr_ref, eattr_ref, eemb_ref, src_ref, dst_ref,
                     wfc1_ref, wedge_ref, we_ref, wl1sc_ref, wlin2_ref,
                     o_ref, h_scr, dma_sem):
    layer = pl.program_id(0)
    is_last = layer == pl.num_programs(0) - 1
    f32 = jnp.float32
    bf16 = jnp.bfloat16
    n_pad = h_scr.shape[0]
    e_pad = eattr_ref.shape[0]

    # Layer 0: one manual DMA of the (padded) node input HBM -> resident VMEM.
    @pl.when(layer == 0)
    def _init():
        cp = pltpu.make_async_copy(x_hbm_ref, h_scr, dma_sem)
        cp.start()
        cp.wait()

    # --- edge-scalar MLP on edge_length_embedding (fc_neurons) ---------------
    # wfc2 @ ww is folded into one weight at pack time (no nonlinearity between).
    h1 = jnp.dot(eemb_ref[...], wfc1_ref[0], preferred_element_type=f32)
    h1 = h1 * jax.nn.sigmoid(h1)                                   # SiLU (f32)
    esc = jnp.dot(h1.astype(bf16), wedge_ref[0],
                  preferred_element_type=f32)                      # [E, D] edge scale
    # TODO(synk): dense analog of the irrep-wise weighted tensor product.
    emx = jnp.dot(eattr_ref[...], we_ref[0],
                  preferred_element_type=f32)                      # [E, D] edge mix

    # --- node side: fused [lin1 | sc] matmul on (features * node_attr) -------
    xa = (h_scr[...] * attr_ref[...]).astype(bf16)                 # attr lane-broadcast
    y = jnp.dot(xa, wl1sc_ref[0], preferred_element_type=f32)      # [N, 2*D_PAD]
    feat = y[:, :D_PAD]
    sc = y[:, D_PAD:]

    # --- gather (edge_src) / scatter-sum (edge_dst) as one-hot MXU matmuls ---
    # Padded edges carry src/dst = -1 so their one-hot rows/cols are all-zero.
    iota_en = jax.lax.broadcasted_iota(jnp.int32, (e_pad, n_pad), 1)
    onehot_src = jnp.where(iota_en == src_ref[...], 1.0, 0.0).astype(bf16)    # [E, N]
    fsrc = jnp.dot(onehot_src, feat.astype(bf16),
                   preferred_element_type=f32)                                # gather

    msg = fsrc * esc + emx                                          # f32 VPU FMA

    iota_ne = jax.lax.broadcasted_iota(jnp.int32, (n_pad, e_pad), 0)
    onehot_dst_t = jnp.where(iota_ne == dst_ref[...], 1.0, 0.0).astype(bf16)  # [N, E]
    agg = jnp.dot(onehot_dst_t, msg.astype(bf16),
                  preferred_element_type=f32)                                 # scatter

    # lin2 (1/sqrt(num_neighbors) folded into the weight) + self-connection.
    conv = jnp.dot(agg.astype(bf16), wlin2_ref[0], preferred_element_type=f32)
    out = sc + conv

    @pl.when(jnp.logical_not(is_last))
    def _hidden():
        # Gate analog: scalar SiLU over all channels (last layer un-gated).
        # TODO(synk): irrep-wise Gate.
        h_scr[...] = out * jax.nn.sigmoid(out)

    @pl.when(is_last)
    def _final():
        o_ref[...] = out.astype(o_ref.dtype)


# ---------------------------------------------------------------------------
# Parameter construction (mirrors the MessagePassing stack) + packing.
# ---------------------------------------------------------------------------
def irreps_dim(lmax, mul_per_irrep):
    # [(mul//4, (l, p)) for l in range(lmax+1) for p in (-1, 1)]
    return sum(mul_per_irrep * (2 * l + 1) for l in range(lmax + 1) for _ in (-1, 1))


def init_generator_params(key, *, d_in, d_attr, d_edge, lmax, mul, mpn_layers,
                          number_of_basis):
    del d_attr  # node_attr is scalar ("1x0e"); consumed multiplicatively in-kernel
    d_hidden = irreps_dim(lmax, mul // 4)        # irreps_node_hidden dim
    d_out_final = 3                              # irreps_node_out = 1x1o
    dims = [d_in] + mpn_layers * [d_hidden] + [d_out_final]

    params = []
    for i in range(len(dims) - 1):
        di, do = dims[i], dims[i + 1]
        keys = jax.random.split(jax.random.fold_in(key, i), 7)
        s = lambda fan: 1.0 / math.sqrt(max(fan, 1))
        params.append({
            "wfc1":  jax.random.normal(keys[0], (number_of_basis, mul), jnp.float32) * s(number_of_basis),
            "wfc2":  jax.random.normal(keys[1], (mul, 2 * mul), jnp.float32) * s(mul),
            "ww":    jax.random.normal(keys[2], (2 * mul, do), jnp.float32) * s(2 * mul),
            "wlin1": jax.random.normal(keys[3], (di, do), jnp.float32) * s(di),
            "we":    jax.random.normal(keys[4], (d_edge, do), jnp.float32) * s(d_edge),
            "wsc":   jax.random.normal(keys[5], (di, do), jnp.float32) * s(di),
            "wlin2": jax.random.normal(keys[6], (do, do), jnp.float32) * s(do),
        })
    return params


def pack_generator_params(params, *, num_neighbors):
    """Pad to lane-dense widths, fuse [lin1|sc], fold wfc2 @ ww (mathematically
    exact) and 1/sqrt(num_neighbors) into the weights, stack per-layer weights
    on a leading axis and cast to bf16 for the MXU (f32 accumulation)."""
    bf16 = jnp.bfloat16
    nb = params[0]["wfc1"].shape[0]
    h1 = params[0]["wfc1"].shape[1]
    de = params[0]["we"].shape[0]
    NB_PAD = _round_up(nb, 128)
    H1_PAD = _round_up(h1, 128)
    DE_PAD = _round_up(de, 128)
    inv_sqrt_nn = 1.0 / math.sqrt(num_neighbors)

    wfc1_s, wedge_s, we_s, wl1sc_s, wlin2_s = [], [], [], [], []
    for p in params:
        di, do = p["wlin1"].shape
        assert di <= D_PAD and do <= D_PAD
        wfc1_s.append(_pad2d(p["wfc1"], NB_PAD, H1_PAD, bf16))
        # Fold wfc2 @ ww in f32 (no nonlinearity between them in the module).
        wedge_s.append(_pad2d(p["wfc2"] @ p["ww"], H1_PAD, D_PAD, bf16))
        we_s.append(_pad2d(p["we"], DE_PAD, D_PAD, bf16))
        wl1sc = jnp.zeros((D_PAD, 2 * D_PAD), jnp.float32)
        wl1sc = wl1sc.at[:di, :do].set(p["wlin1"])
        wl1sc = wl1sc.at[:di, D_PAD:D_PAD + do].set(p["wsc"])
        wl1sc_s.append(wl1sc.astype(bf16))
        wlin2_s.append(_pad2d(p["wlin2"] * inv_sqrt_nn, D_PAD, D_PAD, bf16))

    return {
        "wfc1": jnp.stack(wfc1_s), "wedge": jnp.stack(wedge_s),
        "we": jnp.stack(we_s), "wl1sc": jnp.stack(wl1sc_s),
        "wlin2": jnp.stack(wlin2_s),
        "dims": {"NB_PAD": NB_PAD, "H1_PAD": H1_PAD, "DE_PAD": DE_PAD,
                 "d_out": params[-1]["wlin2"].shape[1]},
    }


# ---------------------------------------------------------------------------
# Generator forward: one fused pallas_call for all message-passing layers.
# ---------------------------------------------------------------------------
def generator_forward(packed, x, node_attr, edge_src, edge_dst, edge_attr,
                      edge_length_embedding, batch):
    del batch  # passed in the PyTorch forward but unused by mp1 (same here)
    n_nodes = int(x.shape[0])
    n_edges = int(edge_src.shape[0])
    d = packed["dims"]
    NB_PAD, H1_PAD, DE_PAD = d["NB_PAD"], d["H1_PAD"], d["DE_PAD"]
    L = int(packed["wfc1"].shape[0])
    N_PAD = _round_up(n_nodes, _SUB)
    E_PAD = _round_up(n_edges, _SUB)

    # Host-side layout plumbing (layer-invariant, uploaded once).
    x_pad = _pad2d(x, N_PAD, D_PAD, jnp.float32)
    attr_col = jnp.zeros((N_PAD, 1), jnp.float32).at[:n_nodes, :].set(
        node_attr.astype(jnp.float32)[:, :1])
    eattr_pad = _pad2d(edge_attr, E_PAD, DE_PAD, jnp.bfloat16)
    eemb_pad = _pad2d(edge_length_embedding, E_PAD, NB_PAD, jnp.bfloat16)
    # Padded edges get index -1 so their in-kernel one-hot rows/cols are zero.
    src_col = jnp.full((E_PAD, 1), -1, jnp.int32).at[:n_edges, 0].set(
        edge_src.astype(jnp.int32))
    dst_row = jnp.full((1, E_PAD), -1, jnp.int32).at[0, :n_edges].set(
        edge_dst.astype(jnp.int32))

    def wspec(rows, cols):
        return pl.BlockSpec((1, rows, cols), lambda l: (l, 0, 0))

    flops_layer = (2 * E_PAD * NB_PAD * H1_PAD        # edge MLP layer 1
                   + 2 * E_PAD * H1_PAD * D_PAD       # folded wfc2·ww
                   + 2 * E_PAD * DE_PAD * D_PAD       # edge_attr mixing
                   + 2 * N_PAD * D_PAD * 2 * D_PAD    # fused [lin1 | sc]
                   + 2 * E_PAD * N_PAD * D_PAD        # one-hot gather matmul
                   + 2 * N_PAD * E_PAD * D_PAD        # one-hot scatter-sum matmul
                   + 2 * N_PAD * D_PAD * D_PAD        # lin2
                   + 4 * E_PAD * D_PAD + 4 * N_PAD * D_PAD)
    trans_layer = E_PAD * H1_PAD + N_PAD * D_PAD
    bytes_in = sum(int(a.size) * a.dtype.itemsize for a in
                   (x_pad, attr_col, eattr_pad, eemb_pad, src_col, dst_row,
                    packed["wfc1"], packed["wedge"], packed["we"],
                    packed["wl1sc"], packed["wlin2"]))
    cost = pl.CostEstimate(flops=L * flops_layer,
                           transcendentals=L * trans_layer,
                           bytes_accessed=bytes_in + N_PAD * D_PAD * 4)

    # TODO(synk): for very large E, add an edge-chunk grid axis (+ explicit
    #             vmem_limit_bytes) and split chunks across v7x's two TCs.
    out_pad = pl.pallas_call(
        _fused_mp_kernel,
        out_shape=jax.ShapeDtypeStruct((N_PAD, D_PAD), jnp.float32),
        grid_spec=pltpu.PrefetchScalarGridSpec(
            num_scalar_prefetch=0,
            grid=(L,),
            in_specs=[
                pl.BlockSpec(memory_space=pl.ANY),                # x (HBM; DMA at layer 0)
                pl.BlockSpec((N_PAD, 1), lambda l: (0, 0)),       # node_attr column
                pl.BlockSpec((E_PAD, DE_PAD), lambda l: (0, 0)),  # edge_attr
                pl.BlockSpec((E_PAD, NB_PAD), lambda l: (0, 0)),  # edge_length_embedding
                pl.BlockSpec((E_PAD, 1), lambda l: (0, 0)),       # edge_src column
                pl.BlockSpec((1, E_PAD), lambda l: (0, 0)),       # edge_dst row
                wspec(NB_PAD, H1_PAD),                            # fc layer 1
                wspec(H1_PAD, D_PAD),                             # folded wfc2·ww
                wspec(DE_PAD, D_PAD),                             # we
                wspec(D_PAD, 2 * D_PAD),                          # [lin1 | sc]
                wspec(D_PAD, D_PAD),                              # lin2 (pre-scaled)
            ],
            out_specs=pl.BlockSpec((N_PAD, D_PAD), lambda l: (0, 0)),
            scratch_shapes=[
                pltpu.VMEM((N_PAD, D_PAD), jnp.float32),          # h, resident across layers
                pltpu.SemaphoreType.DMA(()),                      # layer-0 input DMA
            ]),
        compiler_params=pltpu.CompilerParams(
            dimension_semantics=("arbitrary",)),                  # layer axis carries state
        cost_estimate=cost,
    )(x_pad, attr_col, eattr_pad, eemb_pad, src_col, dst_row,
      packed["wfc1"], packed["wedge"], packed["we"],
      packed["wl1sc"], packed["wlin2"])

    return out_pad[:n_nodes, :d["d_out"]]   # [N, 3] ~ irreps_node_out = "1x1o"


# ---------------------------------------------------------------------------
# Plain-JAX reference of the same dense analog (mirrors the kernel's bf16
# operand / f32 accumulate quantization — including the mathematically exact
# wfc2·ww fold — so the check isolates dataflow bugs).
# ---------------------------------------------------------------------------
def generator_reference(params, x, node_attr, edge_src, edge_dst, edge_attr,
                        edge_length_embedding, *, num_neighbors):
    hi = jax.lax.Precision.HIGHEST
    q = lambda a: a.astype(jnp.bfloat16).astype(jnp.float32)
    qdot = lambda a, b: jnp.dot(q(a), q(b), precision=hi)
    inv = 1.0 / math.sqrt(num_neighbors)

    h = x
    n_layers = len(params)
    for i, p in enumerate(params):
        hw = qdot(edge_length_embedding, p["wfc1"])
        hw = hw * jax.nn.sigmoid(hw)
        esc = qdot(hw, p["wfc2"] @ p["ww"])          # folded (associativity-exact)
        emx = qdot(edge_attr, p["we"])
        xa = h * node_attr
        feat = qdot(xa, p["wlin1"])
        sc = qdot(xa, p["wsc"])
        msg = q(feat)[edge_src] * esc + emx          # bf16 gather operand, like kernel
        agg = jax.ops.segment_sum(q(msg), edge_dst, num_segments=h.shape[0])
        out = sc + qdot(agg, p["wlin2"] * inv)
        if i < n_layers - 1:
            out = out * jax.nn.sigmoid(out)
        h = out
    return h


if __name__ == "__main__":
    key = jax.random.PRNGKey(0)

    # Small configuration consistent with the module's __init__.
    lmax = 1
    mul = 8
    mpn_layers = 2
    number_of_basis = 8
    num_neighbors = 2

    n_nodes = 8
    d_in = 8                     # irreps_node_input ~ "8x0e"
    d_attr = 1                   # irreps_node_attr  ~ "1x0e"
    d_edge = (lmax + 1) ** 2     # spherical harmonics up to lmax -> 4

    # Deterministic ring graph: each node sends to its two neighbors.
    src_list, dst_list = [], []
    for n in range(n_nodes):
        for step in (1, n_nodes - 1):
            src_list.append(n)
            dst_list.append((n + step) % n_nodes)
    edge_src = jnp.array(src_list, dtype=jnp.int32)      # [E] = [16]
    edge_dst = jnp.array(dst_list, dtype=jnp.int32)
    n_edges = edge_src.shape[0]

    k1, k2, k3, k4 = jax.random.split(key, 4)
    x = jax.random.normal(k1, (n_nodes, d_in), jnp.float32)
    node_attr = jnp.ones((n_nodes, d_attr), jnp.float32)             # trivial "1x0e"
    edge_attr = jax.random.normal(k2, (n_edges, d_edge), jnp.float32)
    edge_length_embedding = jax.random.normal(k3, (n_edges, number_of_basis), jnp.float32)
    batch = jnp.zeros((n_nodes,), jnp.int32)

    params = init_generator_params(
        k4, d_in=d_in, d_attr=d_attr, d_edge=d_edge, lmax=lmax, mul=mul,
        mpn_layers=mpn_layers, number_of_basis=number_of_basis)
    packed = pack_generator_params(params, num_neighbors=num_neighbors)

    out = generator_forward(packed, x, node_attr, edge_src, edge_dst,
                            edge_attr, edge_length_embedding, batch)
    out = jax.block_until_ready(out)
    assert out.shape == (n_nodes, 3) and out.dtype == jnp.float32

    ref = generator_reference(params, x, node_attr, edge_src, edge_dst,
                              edge_attr, edge_length_embedding,
                              num_neighbors=num_neighbors)
    err = float(jnp.max(jnp.abs(out - ref)))
    assert err < 5e-2, f"kernel vs reference max abs err = {err}"
    print("KERNEL_OK")
</pallas_src>

<mosaic_0001>
module attributes {stable_mosaic.version = 11 : i64} {
  func.func @_fused_mp_kernel(%arg0: i32, %arg1: memref<16x128xf32, #tpu.memory_space<any>>, %arg2: memref<16x1xf32, #tpu.memory_space<vmem>>, %arg3: memref<16x128xbf16, #tpu.memory_space<vmem>>, %arg4: memref<16x128xbf16, #tpu.memory_space<vmem>>, %arg5: memref<16x1xi32, #tpu.memory_space<vmem>>, %arg6: memref<1x16xi32, #tpu.memory_space<vmem>>, %arg7: memref<1x128x128xbf16, #tpu.memory_space<vmem>>, %arg8: memref<1x128x128xbf16, #tpu.memory_space<vmem>>, %arg9: memref<1x128x128xbf16, #tpu.memory_space<vmem>>, %arg10: memref<1x128x256xbf16, #tpu.memory_space<vmem>>, %arg11: memref<1x128x128xbf16, #tpu.memory_space<vmem>>, %arg12: memref<16x128xf32, #tpu.memory_space<vmem>>, %arg13: memref<16x128xf32, #tpu.memory_space<vmem>>, %arg14: memref<!tpu.dma_semaphore, #tpu.memory_space<semaphore_mem>>) attributes {dimension_semantics = [#tpu.dimension_semantics<arbitrary>], iteration_bounds = array<i64: 3>, scalar_prefetch = 0 : i64, scratch_operands = 2 : i64, tpu.core_type = #tpu.core_type<tc>, window_params = [{}, {pipeline_mode = #tpu.pipeline_mode<synchronous>, transform_indices = @transform_1, window_bounds = array<i64: 16, 1>}, {pipeline_mode = #tpu.pipeline_mode<synchronous>, transform_indices = @transform_2, window_bounds = array<i64: 16, 128>}, {pipeline_mode = #tpu.pipeline_mode<synchronous>, transform_indices = @transform_3, window_bounds = array<i64: 16, 128>}, {pipeline_mode = #tpu.pipeline_mode<synchronous>, transform_indices = @transform_4, window_bounds = array<i64: 16, 1>}, {pipeline_mode = #tpu.pipeline_mode<synchronous>, transform_indices = @transform_5, window_bounds = array<i64: 1, 16>}, {transform_indices = @transform_6, window_bounds = array<i64: 1, 128, 128>}, {transform_indices = @transform_7, window_bounds = array<i64: 1, 128, 128>}, {transform_indices = @transform_8, window_bounds = array<i64: 1, 128, 128>}, {transform_indices = @transform_9, window_bounds = array<i64: 1, 128, 256>}, {transform_indices = @transform_10, window_bounds = array<i64: 1, 128, 128>}, {pipeline_mode = #tpu.pipeline_mode<synchronous>, transform_indices = @transform_11, window_bounds = array<i64: 16, 128>}]} {
    %c2_i32 = arith.constant 2 : i32
    %0 = arith.cmpi eq, %arg0, %c2_i32 : i32
    %c0_i32 = arith.constant 0 : i32
    %1 = arith.cmpi eq, %arg0, %c0_i32 : i32
    %2 = arith.extui %1 : i1 to i32
    %c0_i32_0 = arith.constant 0 : i32
    %3 = arith.cmpi ne, %2, %c0_i32_0 : i32
    scf.if %3 {
      tpu.enqueue_dma source(%arg1 : memref<16x128xf32, #tpu.memory_space<any>>) target(%arg13 : memref<16x128xf32, #tpu.memory_space<vmem>>) target_semaphore(%arg14 : memref<!tpu.dma_semaphore, #tpu.memory_space<semaphore_mem>>)
      tpu.wait_dma2 semaphore(%arg14 : memref<!tpu.dma_semaphore, #tpu.memory_space<semaphore_mem>>) src(%arg1 : memref<16x128xf32, #tpu.memory_space<any>>) dst(%arg13 : memref<16x128xf32, #tpu.memory_space<vmem>>)
    } else {
    }
    %c0 = arith.constant 0 : index
    %c0_1 = arith.constant 0 : index
    %4 = vector.load %arg4[%c0, %c0_1] : memref<16x128xbf16, #tpu.memory_space<vmem>>, vector<16x128xbf16>
    %c0_2 = arith.constant 0 : index
    %c0_3 = arith.constant 0 : index
    %c0_4 = arith.constant 0 : index
    %5 = vector.load %arg7[%c0_2, %c0_3, %c0_4] : memref<1x128x128xbf16, #tpu.memory_space<vmem>>, vector<1x128x128xbf16>
    %6 = vector.shape_cast %5 : vector<1x128x128xbf16> to vector<128x128xbf16>
    %cst = arith.constant dense<0.000000e+00> : vector<16x128xf32>
    %7 = tpu.matmul %4, %6, %cst {dimension_numbers = #tpu.dot_dimension_numbers<[1], [0], [0], [1], [0, 0, 1, 1], [], []>} : vector<16x128xbf16>, vector<128x128xbf16>, vector<16x128xf32> -> vector<16x128xf32>
    %8 = arith.negf %7 : vector<16x128xf32>
    %9 = math.exp %8 : vector<16x128xf32>
    %cst_5 = arith.constant 1.000000e+00 : f32
    %10 = vector.broadcast %cst_5 : f32 to vector<16x128xf32>
    %11 = arith.addf %10, %9 : vector<16x128xf32>
    %12 = arith.divf %10, %11 : vector<16x128xf32>
    %13 = arith.mulf %7, %12 : vector<16x128xf32>
    %14 = arith.truncf %13 : vector<16x128xf32> to vector<16x128xbf16>
    %c0_6 = arith.constant 0 : index
    %c0_7 = arith.constant 0 : index
    %c0_8 = arith.constant 0 : index
    %15 = vector.load %arg8[%c0_6, %c0_7, %c0_8] : memref<1x128x128xbf16, #tpu.memory_space<vmem>>, vector<1x128x128xbf16>
    %16 = vector.shape_cast %15 : vector<1x128x128xbf16> to vector<128x128xbf16>
    %cst_9 = arith.constant dense<0.000000e+00> : vector<16x128xf32>
    %17 = tpu.matmul %14, %16, %cst_9 {dimension_numbers = #tpu.dot_dimension_numbers<[1], [0], [0], [1], [0, 0, 1, 1], [], []>} : vector<16x128xbf16>, vector<128x128xbf16>, vector<16x128xf32> -> vector<16x128xf32>
    %c0_10 = arith.constant 0 : index
    %c0_11 = arith.constant 0 : index
    %18 = vector.load %arg3[%c0_10, %c0_11] : memref<16x128xbf16, #tpu.memory_space<vmem>>, vector<16x128xbf16>
    %c0_12 = arith.constant 0 : index
    %c0_13 = arith.constant 0 : index
    %c0_14 = arith.constant 0 : index
    %19 = vector.load %arg9[%c0_12, %c0_13, %c0_14] : memref<1x128x128xbf16, #tpu.memory_space<vmem>>, vector<1x128x128xbf16>
    %20 = vector.shape_cast %19 : vector<1x128x128xbf16> to vector<128x128xbf16>
    %cst_15 = arith.constant dense<0.000000e+00> : vector<16x128xf32>
    %21 = tpu.matmul %18, %20, %cst_15 {dimension_numbers = #tpu.dot_dimension_numbers<[1], [0], [0], [1], [0, 0, 1, 1], [], []>} : vector<16x128xbf16>, vector<128x128xbf16>, vector<16x128xf32> -> vector<16x128xf32>
    %c0_16 = arith.constant 0 : index
    %c0_17 = arith.constant 0 : index
    %22 = vector.load %arg13[%c0_16, %c0_17] : memref<16x128xf32, #tpu.memory_space<vmem>>, vector<16x128xf32>
    %c0_18 = arith.constant 0 : index
    %c0_19 = arith.constant 0 : index
    %23 = vector.load %arg2[%c0_18, %c0_19] : memref<16x1xf32, #tpu.memory_space<vmem>>, vector<16x1xf32>
    %24 = vector.broadcast %23 : vector<16x1xf32> to vector<16x128xf32>
    %25 = arith.mulf %22, %24 : vector<16x128xf32>
    %26 = arith.truncf %25 : vector<16x128xf32> to vector<16x128xbf16>
    %c0_20 = arith.constant 0 : index
    %c0_21 = arith.constant 0 : index
    %c0_22 = arith.constant 0 : index
    %27 = vector.load %arg10[%c0_20, %c0_21, %c0_22] : memref<1x128x256xbf16, #tpu.memory_space<vmem>>, vector<1x128x256xbf16>
    %28 = vector.shape_cast %27 : vector<1x128x256xbf16> to vector<128x256xbf16>
    %cst_23 = arith.constant dense<0.000000e+00> : vector<16x256xf32>
    %29 = tpu.matmul %26, %28, %cst_23 {dimension_numbers = #tpu.dot_dimension_numbers<[1], [0], [0], [1], [0, 0, 1, 1], [], []>} : vector<16x128xbf16>, vector<128x256xbf16>, vector<16x256xf32> -> vector<16x256xf32>
    %30 = vector.extract_strided_slice %29 {offsets = [0, 0], sizes = [16, 128], strides = [1, 1]} : vector<16x256xf32> to vector<16x128xf32>
    %31 = vector.extract_strided_slice %29 {offsets = [0, 128], sizes = [16, 128], strides = [1, 1]} : vector<16x256xf32> to vector<16x128xf32>
    %32 = tpu.iota {dimensions = array<i32: 1>} : vector<16x16xi32>
    %c0_24 = arith.constant 0 : index
    %c0_25 = arith.constant 0 : index
    %33 = vector.load %arg5[%c0_24, %c0_25] : memref<16x1xi32, #tpu.memory_space<vmem>>, vector<16x1xi32>
    %34 = vector.broadcast %33 : vector<16x1xi32> to vector<16x16xi32>
    %35 = arith.cmpi eq, %32, %34 : vector<16x16xi32>
    %cst_26 = arith.constant 1.000000e+00 : f32
    %cst_27 = arith.constant 0.000000e+00 : f32
    %36 = vector.broadcast %cst_26 : f32 to vector<16x16xf32>
    %37 = vector.broadcast %cst_27 : f32 to vector<16x16xf32>
    %38 = arith.select %35, %36, %37 : vector<16x16xi1>, vector<16x16xf32>
    %39 = arith.truncf %38 : vector<16x16xf32> to vector<16x16xbf16>
    %40 = arith.truncf %30 : vector<16x128xf32> to vector<16x128xbf16>
    %cst_28 = arith.constant dense<0.000000e+00> : vector<16x128xf32>
    %41 = tpu.matmul %39, %40, %cst_28 {dimension_numbers = #tpu.dot_dimension_numbers<[1], [0], [0], [1], [0, 0, 1, 1], [], []>} : vector<16x16xbf16>, vector<16x128xbf16>, vector<16x128xf32> -> vector<16x128xf32>
    %42 = arith.mulf %41, %17 : vector<16x128xf32>
    %43 = arith.addf %42, %21 : vector<16x128xf32>
    %44 = tpu.iota {dimensions = array<i32: 0>} : vector<16x16xi32>
    %c0_29 = arith.constant 0 : index
    %c0_30 = arith.constant 0 : index
    %45 = vector.load %arg6[%c0_29, %c0_30] : memref<1x16xi32, #tpu.memory_space<vmem>>, vector<1x16xi32>
    %46 = vector.broadcast %45 : vector<1x16xi32> to vector<16x16xi32>
    %47 = arith.cmpi eq, %44, %46 : vector<16x16xi32>
    %cst_31 = arith.constant 1.000000e+00 : f32
    %cst_32 = arith.constant 0.000000e+00 : f32
    %48 = vector.broadcast %cst_31 : f32 to vector<16x16xf32>
    %49 = vector.broadcast %cst_32 : f32 to vector<16x16xf32>
    %50 = arith.select %47, %48, %49 : vector<16x16xi1>, vector<16x16xf32>
    %51 = arith.truncf %50 : vector<16x16xf32> to vector<16x16xbf16>
    %52 = arith.truncf %43 : vector<16x128xf32> to vector<16x128xbf16>
    %cst_33 = arith.constant dense<0.000000e+00> : vector<16x128xf32>
    %53 = tpu.matmul %51, %52, %cst_33 {dimension_numbers = #tpu.dot_dimension_numbers<[1], [0], [0], [1], [0, 0, 1, 1], [], []>} : vector<16x16xbf16>, vector<16x128xbf16>, vector<16x128xf32> -> vector<16x128xf32>
    %54 = arith.truncf %53 : vector<16x128xf32> to vector<16x128xbf16>
    %c0_34 = arith.constant 0 : index
    %c0_35 = arith.constant 0 : index
    %c0_36 = arith.constant 0 : index
    %55 = vector.load %arg11[%c0_34, %c0_35, %c0_36] : memref<1x128x128xbf16, #tpu.memory_space<vmem>>, vector<1x128x128xbf16>
    %56 = vector.shape_cast %55 : vector<1x128x128xbf16> to vector<128x128xbf16>
    %cst_37 = arith.constant dense<0.000000e+00> : vector<16x128xf32>
    %57 = tpu.matmul %54, %56, %cst_37 {dimension_numbers = #tpu.dot_dimension_numbers<[1], [0], [0], [1], [0, 0, 1, 1], [], []>} : vector<16x128xbf16>, vector<128x128xbf16>, vector<16x128xf32> -> vector<16x128xf32>
    %58 = arith.addf %31, %57 : vector<16x128xf32>
    %true = arith.constant true
    %59 = arith.xori %0, %true : i1
    %60 = arith.extui %59 : i1 to i32
    %c0_i32_38 = arith.constant 0 : i32
    %61 = arith.cmpi ne, %60, %c0_i32_38 : i32
    scf.if %61 {
      %64 = arith.negf %58 : vector<16x128xf32>
      %65 = math.exp %64 : vector<16x128xf32>
      %cst_40 = arith.constant 1.000000e+00 : f32
      %66 = vector.broadcast %cst_40 : f32 to vector<16x128xf32>
      %67 = arith.addf %66, %65 : vector<16x128xf32>
      %68 = arith.divf %66, %67 : vector<16x128xf32>
      %69 = arith.mulf %58, %68 : vector<16x128xf32>
      %c0_41 = arith.constant 0 : index
      %c0_42 = arith.constant 0 : index
      %70 = vector.load %arg13[%c0_41, %c0_42] : memref<16x128xf32, #tpu.memory_space<vmem>>, vector<16x128xf32>
      tpu.vector_store %arg13[%c0_41, %c0_42], %69 {strides = array<i32>} : memref<16x128xf32, #tpu.memory_space<vmem>>, vector<16x128xf32>,
    } else {
    }
    %62 = arith.extui %0 : i1 to i32
    %c0_i32_39 = arith.constant 0 : i32
    %63 = arith.cmpi ne, %62, %c0_i32_39 : i32
    scf.if %63 {
      %c0_40 = arith.constant 0 : index
      %c0_41 = arith.constant 0 : index
      %64 = vector.load %arg12[%c0_40, %c0_41] : memref<16x128xf32, #tpu.memory_space<vmem>>, vector<16x128xf32>
      tpu.vector_store %arg12[%c0_40, %c0_41], %58 {strides = array<i32>} : memref<16x128xf32, #tpu.memory_space<vmem>>, vector<16x128xf32>,
    } else {
    }
    return
  }
  func.func @transform_1(%arg0: i32) -> (i32, i32) {
    %c0_i32 = arith.constant 0 : i32
    %c0_i32_0 = arith.constant 0 : i32
    %c0_i32_1 = arith.constant 0 : i32
    return %c0_i32, %c0_i32_0 : i32, i32
  }
  func.func @transform_2(%arg0: i32) -> (i32, i32) {
    %c0_i32 = arith.constant 0 : i32
    %c0_i32_0 = arith.constant 0 : i32
    %c0_i32_1 = arith.constant 0 : i32
    return %c0_i32, %c0_i32_0 : i32, i32
  }
  func.func @transform_3(%arg0: i32) -> (i32, i32) {
    %c0_i32 = arith.constant 0 : i32
    %c0_i32_0 = arith.constant 0 : i32
    %c0_i32_1 = arith.constant 0 : i32
    return %c0_i32, %c0_i32_0 : i32, i32
  }
  func.func @transform_4(%arg0: i32) -> (i32, i32) {
    %c0_i32 = arith.constant 0 : i32
    %c0_i32_0 = arith.constant 0 : i32
    %c0_i32_1 = arith.constant 0 : i32
    return %c0_i32, %c0_i32_0 : i32, i32
  }
  func.func @transform_5(%arg0: i32) -> (i32, i32) {
    %c0_i32 = arith.constant 0 : i32
    %c0_i32_0 = arith.constant 0 : i32
    %c0_i32_1 = arith.constant 0 : i32
    return %c0_i32, %c0_i32_0 : i32, i32
  }
  func.func @transform_6(%arg0: i32) -> (i32, i32, i32) {
    %c0_i32 = arith.constant 0 : i32
    %c0_i32_0 = arith.constant 0 : i32
    %c0_i32_1 = arith.constant 0 : i32
    return %arg0, %c0_i32, %c0_i32_0 : i32, i32, i32
  }
  func.func @transform_7(%arg0: i32) -> (i32, i32, i32) {
    %c0_i32 = arith.constant 0 : i32
    %c0_i32_0 = arith.constant 0 : i32
    %c0_i32_1 = arith.constant 0 : i32
    return %arg0, %c0_i32, %c0_i32_0 : i32, i32, i32
  }
  func.func @transform_8(%arg0: i32) -> (i32, i32, i32) {
    %c0_i32 = arith.constant 0 : i32
    %c0_i32_0 = arith.constant 0 : i32
    %c0_i32_1 = arith.constant 0 : i32
    return %arg0, %c0_i32, %c0_i32_0 : i32, i32, i32
  }
  func.func @transform_9(%arg0: i32) -> (i32, i32, i32) {
    %c0_i32 = arith.constant 0 : i32
    %c0_i32_0 = arith.constant 0 : i32
    %c0_i32_1 = arith.constant 0 : i32
    return %arg0, %c0_i32, %c0_i32_0 : i32, i32, i32
  }
  func.func @transform_10(%arg0: i32) -> (i32, i32, i32) {
    %c0_i32 = arith.constant 0 : i32
    %c0_i32_0 = arith.constant 0 : i32
    %c0_i32_1 = arith.constant 0 : i32
    return %arg0, %c0_i32, %c0_i32_0 : i32, i32, i32
  }
  func.func @transform_11(%arg0: i32) -> (i32, i32) {
    %c0_i32 = arith.constant 0 : i32
    %c0_i32_0 = arith.constant 0 : i32
    %c0_i32_1 = arith.constant 0 : i32
    return %c0_i32, %c0_i32_0 : i32, i32
  }
}

</mosaic_0001>

<bundles_post_ra>
// kernel: tpu_custom_call.1
= control target key start
LH: loop header
LB: loop body
LE: loop exit
PB: predicated region body
PF: predicated region fallthrough
CT: control target
= control target key end

     0   :  { %s2618_s0 = inlined_call_operand.vmem [shape: f32[16,128], index: 0, kind: input, shape index: {}]   ;;  %s2619_s1 = inlined_call_operand.vmem [shape: f32[16,1], index: 1, kind: input, shape index: {}]   ;;  %s2620_s2 = inlined_call_operand.vmem [shape: bf16[16,128], index: 2, kind: input, shape index: {}]   ;;  %s2621_s3 = inlined_call_operand.vmem [shape: bf16[16,128], index: 3, kind: input, shape index: {}]   ;;  %s2622_s4 = inlined_call_operand.vmem [shape: s32[16,1], index: 4, kind: input, shape index: {}]   ;;  %s2623_s5 = inlined_call_operand.vmem [shape: s32[1,16], index: 5, kind: input, shape index: {}]   ;;  %s2624_s6 = inlined_call_operand.hbm [shape: bf16[3,128,128], index: 6, kind: input, shape index: {}]   ;;  %s2625_s7 = inlined_call_operand.hbm [shape: bf16[3,128,128], index: 7, kind: input, shape index: {}]   ;;  %s2626_s8 = inlined_call_operand.hbm [shape: bf16[3,128,128], index: 8, kind: input, shape index: {}]   ;;  %s2627_s9 = inlined_call_operand.hbm [shape: bf16[3,128,256], index: 9, kind: input, shape index: {}]   ;;  %s2628_s10 = inlined_call_operand.hbm [shape: bf16[3,128,128], index: 10, kind: input, shape index: {}]   ;;  %s2629_s11 = inlined_call_operand.hbm [shape: f32[16,128], index: 11, kind: output, shape index: {}]  }
   0x1   :  { %2640 = sst [smem:[#allocation23_spill]] %s2620_s2 }
   0x2   :  { %2641 = sst [smem:[#allocation24_spill]] %s2623_s5 }
   0x3   :  { %2642 = sst [smem:[#allocation25_spill]] %s2625_s7 }
   0x4   :  { %2643 = sst [smem:[#allocation26_spill]] %s2629_s11 }
   0x5   :  { %16 = vsyncpa [#allocation5], 0 }
   0x6   :  { %18 = vsyncpa [#allocation5 + $0x1], 0 }
   0x7   :  { %19 = vsyncpa [#allocation8], 0 }
   0x8   :  { %21 = vsyncpa [#allocation8 + $0x1], 0 }
   0x9   :  { %22 = vsyncpa [#allocation11], 0 }
   0xa   :  { %24 = vsyncpa [#allocation11 + $0x1], 0 }
   0xb   :  { %25 = vsyncpa [#allocation6], 0  ;;  %s2169_s17 = smov 0   ;;  %s2171_s18 = smov 0  }
   0xc   :  { %s2173_s19 = smov 0   ;;  %s2175_s20 = smov 0  }
   0xd LB: > { %2644 = sst [smem:[#allocation20_spill]] %s2088_s19  ;;  %s2188_s21 = sadd.s32 4294967295, %s2092_s20   ;;  %s2092_s20 = sphi %s2175_s20, %s2662_s20   ;;  %s2088_s19 = sphi %s2173_s19, %s2664_s19   ;;  %s2084_s18 = sphi %s2171_s18, %s2666_s18   ;;  %s2080_s17 = sphi %s2169_s17, %s2665_s17  }
   0xe   : > { %s2191_s22 = sadd.s32 1, %s2092_s20   ;;  %s143_s24 = sadd.s32 1, %s2088_s19 }
   0xf   : > { %2645 = sst [smem:[#allocation21_spill]] %s2191_s22  ;;  %s140_s23 = ssub.s32 %s2092_s20, %s2191_s22 }
  0x10   : > { %p141_p0 = scmp.eq.s32.totalorder %s140_s23, 0  ;;  %p150_p1 = scmp.ne.s32.totalorder %s2088_s19, %s2084_s18 }
  0x11   : > { %p151_p2 = scmp.eq.s32.totalorder %s2092_s20, 0  ;;  %p156_p3 = scmp.ne.s32.totalorder %s2084_s18, %s2080_s17 }
  0x12   : > { %s2201_s25 = scalar_select %p141_p0, %s2088_s19, %s143_s24  }
  0x13   : > { %p152_p4 = por %p151_p2, %p150_p1  ;;  %p157_p5 = scmp.eq.s32.totalorder %s2188_s21, 0 }
  0x14   : > { %2646 = sst [smem:[#allocation22_spill]] %s2201_s25  ;;  %p1747_p6 = scmp.lt.s32.totalorder %s2092_s20, 3 }
  0x15   : > { %p2205_p7 = por %p157_p5, %p156_p3  ;;  %s2210_s27 = sand.u32 1, %s2088_s19  }
  0x16   : > { %s2213_s28 = sshll.u32 %s2210_s27, 6  ;;  %s2216_s29 = sshll.u32 %s2092_s20, 10 }
  0x17   : > { %s2647_s26 = scalar_select %p2205_p7, 1, 0 }
  0x18   : > { %p2218_p8 = pnand %p1747_p6, %p152_p4  ;;  %s2633_s12 = sand.u32 1, %s2092_s20  }
  0x19   : > { %s2649_s7 = sld [smem:[#allocation25_spill]]  ;;  %s345_s16 = scalar_lea.vmem [#allocation7], %s2213_s28 }
  0x1a   : > { %s352_s17 = sshll.u32 %s345_s16, 4  ;;  %s2236_s23 = scalar_lea.sflag [#allocation8], %s2633_s12  ;;  %s2231_s17 = int_to_ptr.vmem [resolvable:$true] %s352_s17 }
  0x1b   : > { %p2242_p12 = pneg %p2218_p8 }
  0x1f   : > { %s2227_s15 = scalar_lea.hbm %s2649_s7, %s2216_s29  ;;  %s1873_s25 = scalar_lea.hbm %s2649_s7, 3072 }
  0x20   : > { %s1868_s24 = scalar_lea.hbm %s2227_s15, 1024  ;;  %p1874_p1 = scmp.lt.u32.totalorder %s2227_s15, %s2649_s7 }
  0x21   : > { %p1869_p11 = scmp.ne.s32.totalorder %s2227_s15, %s1868_s24  ;;  %p1875_p2 = scmp.lt.u32.totalorder %s1873_s25, %s1868_s24 }
  0x22   : > { %p1877_p4 = scmp.lt.u32.totalorder %s1868_s24, %s2227_s15 }
  0x23   : > { %p1871_p13 = pnand %p2242_p12, %p1869_p11  ;;  %p1876_p3 = por %p1875_p2, %p1874_p1 }
  0x25   : > { %p1872_p0 = pneg %p1871_p13  ;;  %p1878_p5 = por %p1877_p4, %p1876_p3 }
  0x27   : > { %p1879_p6 = pnand %p1878_p5, %p1872_p0 }
  0x29   : > { %1882 = shalt.err (!%p1879_p6)
}
  0x2a   : > { %s1883_s12 = scalar_lea.vmem %s2231_s17, 1024  ;;  %s2094_s14 = smov [#allocation7]  }
  0x2b   : > { %p1884_p11 = scmp.ne.s32.totalorder %s2231_s17, %s1883_s12  ;;  %s1888_s16 = sshll.u32 %s2094_s14, 4  ;;  %s1889_s16 = int_to_ptr.vmem [resolvable:$false] %s1888_s16 }
  0x2c   : > { %s1890_s19 = scalar_lea.vmem %s1889_s16, 2048  ;;  %p1891_p10 = scmp.lt.s32.totalorder %s2231_s17, %s1889_s16 }
  0x2d   : > { %p1886_p13 = pnand %p1884_p11, %p2242_p12  ;;  %p1892_p7 = scmp.lt.s32.totalorder %s1890_s19, %s1883_s12 }
  0x2f   : > { %p1887_p9 = pneg %p1886_p13  ;;  %p1893_p1 = por %p1892_p7, %p1891_p10 }
  0x31   : > { %p1894_p2 = pnand %p1893_p1, %p1887_p9 }
  0x33   : > { %1897 = shalt.err (!%p1894_p2)
}
  0x34   : > { %s2636_s22 = smov 64   ;;  %s2638_s25 = smov 4  }
  0x35   : > { %1737 = dma.hbm_to_vmem [thread:$0]  (!%p2218_p8), %s2227_s15, 1024, %s2231_s17, %s2236_s23, %s2636_s22, %s2636_s22, %s2638_s25  }
  0x36   : > { %p2651_p7 = scmp.lt.s32.totalorder %s2092_s20, 4  ;;  %p2652_p9 = scmp.ge.s32.totalorder %s2092_s20, 1 }
  0x37   : > { %s1503_s24 = sshll.u32 %s2210_s27, 7  ;;  %s1583_s14 = sshll.u32 %s2092_s20, 11 }
  0x38   : > { %p2273_p10 = pnand %p2652_p9, %p2651_p7  ;;  %s2282_s7 = scalar_lea.hbm %s2627_s9, %s1583_s14 }
  0x39   : > { %s387_s11 = scalar_lea.vmem [#allocation10], %s1503_s24  ;;  %s2654_s15 = sand.u32 1, %s2092_s20  }
  0x3a   : > { %s2653_s12 = scalar_select %p2273_p10, 1, 0 }
  0x3b   : > { %s394_s5 = sshll.u32 %s387_s11, 4  ;;  %s2288_s17 = scalar_lea.sflag [#allocation11], %s2654_s15  ;;  %s2284_s5 = int_to_ptr.vmem [resolvable:$true] %s394_s5 }
  0x3c   : > { %s1898_s22 = scalar_lea.hbm %s2282_s7, 2048  ;;  %s1903_s14 = scalar_lea.hbm %s2627_s9, 6144 }
  0x3d   : > { %p1899_p0 = scmp.ne.s32.totalorder %s2282_s7, %s1898_s22  ;;  %p1904_p5 = scmp.lt.u32.totalorder %s2282_s7, %s2627_s9 }
  0x3e   : > { %p1905_p6 = scmp.lt.u32.totalorder %s1903_s14, %s1898_s22  ;;  %p1907_p13 = scmp.lt.u32.totalorder %s1898_s22, %s2282_s7 }
  0x3f   : > { %p1901_p3 = pnand %p1899_p0, %p2242_p12 }
  0x40   : > { %p1906_p11 = por %p1905_p6, %p1904_p5 }
  0x41   : > { %p1902_p4 = pneg %p1901_p3 }
  0x42   : > { %p1908_p1 = por %p1907_p13, %p1906_p11 }
  0x44   : > { %p1909_p2 = pnand %p1908_p1, %p1902_p4 }
  0x46   : > { %1912 = shalt.err (!%p1909_p2)
}
  0x47   : > { %s1913_s11 = scalar_lea.vmem %s2284_s5, 2048  ;;  %s2097_s20 = smov [#allocation10]  }
  0x48   : > { %p1914_p7 = scmp.ne.s32.totalorder %s2284_s5, %s1913_s11  ;;  %s1918_s25 = sshll.u32 %s2097_s20, 4  ;;  %s1919_s25 = int_to_ptr.vmem [resolvable:$false] %s1918_s25 }
  0x49   : > { %s1920_s2 = scalar_lea.vmem %s1919_s25, 4096  ;;  %p1921_p3 = scmp.lt.s32.totalorder %s2284_s5, %s1919_s25 }
  0x4a   : > { %p1916_p9 = pnand %p1914_p7, %p2242_p12  ;;  %p1922_p10 = scmp.lt.s32.totalorder %s1920_s2, %s1913_s11 }
  0x4c   : > { %p1917_p0 = pneg %p1916_p9  ;;  %p1923_p5 = por %p1922_p10, %p1921_p3 }
  0x4e   : > { %p1924_p6 = pnand %p1923_p5, %p1917_p0 }
  0x50   : > { %1927 = shalt.err (!%p1924_p6)
}
  0x51   : > { %s2098_s22 = smov 128   ;;  %s2099_s24 = smov 8  }
  0x52   : > { %1743 = dma.hbm_to_vmem [thread:$0]  (!%p2218_p8), %s2282_s7, 2048, %s2284_s5, %s2288_s17, %s2098_s22, %s2098_s22, %s2099_s24  }
  0x53   : > { %s2316_s14 = scalar_lea.hbm %s2624_s6, %s2216_s29  ;;  %s324_s19 = scalar_lea.vmem [#allocation4], %s2213_s28 }
  0x54   : > { %s331_s11 = sshll.u32 %s324_s19, 4  ;;  %s321_s20 = scalar_lea.sflag [#allocation5], %s2210_s27  ;;  %s2319_s11 = int_to_ptr.vmem [resolvable:$true] %s331_s11 }
  0x55   : > { %s1928_s25 = scalar_lea.hbm %s2316_s14, 1024  ;;  %s1933_s2 = scalar_lea.hbm %s2624_s6, 3072 }
  0x56   : > { %p1929_p10 = scmp.ne.s32.totalorder %s2316_s14, %s1928_s25  ;;  %p1934_p13 = scmp.lt.u32.totalorder %s2316_s14, %s2624_s6 }
  0x57   : > { %p1935_p1 = scmp.lt.u32.totalorder %s1933_s2, %s1928_s25  ;;  %p1937_p7 = scmp.lt.u32.totalorder %s1928_s25, %s2316_s14 }
  0x58   : > { %p1931_p4 = pnand %p1929_p10, %p2242_p12 }
  0x59   : > { %p1936_p2 = por %p1935_p1, %p1934_p13 }
  0x5a   : > { %p1932_p11 = pneg %p1931_p4 }
  0x5b   : > { %p1938_p9 = por %p1937_p7, %p1936_p2 }
  0x5d   : > { %p1939_p0 = pnand %p1938_p9, %p1932_p11 }
  0x5f   : > { %1942 = shalt.err (!%p1939_p0)
}
  0x60   : > { %s1943_s15 = scalar_lea.vmem %s2319_s11, 1024  ;;  %s2100_s16 = smov [#allocation4]  }
  0x61   : > { %p1944_p3 = scmp.ne.s32.totalorder %s2319_s11, %s1943_s15  ;;  %s1948_s19 = sshll.u32 %s2100_s16, 4  ;;  %s1949_s19 = int_to_ptr.vmem [resolvable:$false] %s1948_s19 }
  0x62   : > { %s1950_s5 = scalar_lea.vmem %s1949_s19, 2048  ;;  %p1951_p10 = scmp.lt.s32.totalorder %s2319_s11, %s1949_s19 }
  0x63   : > { %p1946_p5 = pnand %p1944_p3, %p2242_p12  ;;  %p1952_p4 = scmp.lt.s32.totalorder %s1950_s5, %s1943_s15 }
  0x65   : > { %p1947_p6 = pneg %p1946_p5  ;;  %p1953_p13 = por %p1952_p4, %p1951_p10 }
  0x67   : > { %p1954_p1 = pnand %p1953_p13, %p1947_p6 }
  0x69   : > { %1957 = shalt.err (!%p1954_p1)
}
  0x6a   : > { %s2655_s25 = smov 4   ;;  %s2656_s7 = smov 64  }
  0x6b   : > { %1734 = dma.hbm_to_vmem [thread:$0]  (!%p2218_p8), %s2316_s14, 1024, %s2319_s11, %s321_s20, %s2656_s7, %s2656_s7, %s2655_s25  }
  0x6c   : > { %s2352_s24 = scalar_lea.hbm %s2626_s8, %s2216_s29  ;;  %s366_s15 = scalar_lea.vmem [#allocation9], %s2213_s28 }
  0x6d   : > { %s373_s16 = sshll.u32 %s366_s15, 4  ;;  %s1958_s27 = scalar_lea.hbm %s2352_s24, 1024  ;;  %s2355_s16 = int_to_ptr.vmem [resolvable:$true] %s373_s16 }
  0x6e   : > { %p1959_p11 = scmp.ne.s32.totalorder %s2352_s24, %s1958_s27  ;;  %s1963_s11 = scalar_lea.hbm %s2626_s8, 3072 }
  0x6f   : > { %p1964_p9 = scmp.lt.u32.totalorder %s2352_s24, %s2626_s8  ;;  %p1965_p0 = scmp.lt.u32.totalorder %s1963_s11, %s1958_s27 }
  0x70   : > { %p1961_p2 = pnand %p1959_p11, %p2242_p12  ;;  %p1967_p5 = scmp.lt.u32.totalorder %s1958_s27, %s2352_s24 }
  0x71   : > { %p1966_p3 = por %p1965_p0, %p1964_p9 }
  0x72   : > { %p1962_p7 = pneg %p1961_p2 }
  0x73   : > { %p1968_p6 = por %p1967_p5, %p1966_p3 }
  0x75   : > { %p1969_p10 = pnand %p1968_p6, %p1962_p7 }
  0x77   : > { %1972 = shalt.err (!%p1969_p10)
}
  0x78   : > { %s1973_s2 = scalar_lea.vmem %s2355_s16, 1024  ;;  %s2101_s22 = smov [#allocation9]  }
  0x79   : > { %p1974_p4 = scmp.ne.s32.totalorder %s2355_s16, %s1973_s2  ;;  %s1978_s15 = sshll.u32 %s2101_s22, 4  ;;  %s1979_s15 = int_to_ptr.vmem [resolvable:$false] %s1978_s15 }
  0x7a   : > { %s1980_s19 = scalar_lea.vmem %s1979_s15, 2048  ;;  %p1981_p11 = scmp.lt.s32.totalorder %s2355_s16, %s1979_s15 }
  0x7b   : > { %p1976_p13 = pnand %p1974_p4, %p2242_p12  ;;  %p1982_p2 = scmp.lt.s32.totalorder %s1980_s19, %s1973_s2 }
  0x7d   : > { %p1977_p1 = pneg %p1976_p13  ;;  %p1983_p9 = por %p1982_p2, %p1981_p11 }
  0x7f   : > { %p1984_p0 = pnand %p1983_p9, %p1977_p1 }
  0x81   : > { %1987 = shalt.err (!%p1984_p0)
}
  0x82   : > { %1740 = dma.hbm_to_vmem [thread:$0]  (!%p2218_p8), %s2352_s24, 1024, %s2355_s16, %s2236_s23, %s2656_s7, %s2656_s7, %s2655_s25  }
  0x83   : > { %s2386_s11 = scalar_lea.hbm %s2628_s10, %s2216_s29  ;;  %s408_s20 = scalar_lea.vmem [#allocation12], %s2213_s28 }
  0x84   : > { %s415_s5 = sshll.u32 %s408_s20, 4  ;;  %s1988_s2 = scalar_lea.hbm %s2386_s11, 1024  ;;  %s2389_s5 = int_to_ptr.vmem [resolvable:$true] %s415_s5 }
  0x85   : > { %p1989_p7 = scmp.ne.s32.totalorder %s2386_s11, %s1988_s2  ;;  %s1993_s24 = scalar_lea.hbm %s2628_s10, 3072 }
  0x86   : > { %p1994_p6 = scmp.lt.u32.totalorder %s2386_s11, %s2628_s10  ;;  %p1995_p10 = scmp.lt.u32.totalorder %s1993_s24, %s1988_s2 }
  0x87   : > { %p1991_p3 = pnand %p1989_p7, %p2242_p12  ;;  %p1997_p13 = scmp.lt.u32.totalorder %s1988_s2, %s2386_s11 }
  0x88   : > { %p1996_p4 = por %p1995_p10, %p1994_p6 }
  0x89   : > { %p1992_p5 = pneg %p1991_p3 }
  0x8a   : > { %p1998_p1 = por %p1997_p13, %p1996_p4 }
  0x8c   : > { %p1999_p11 = pnand %p1998_p1, %p1992_p5 }
  0x8e   : > { %2002 = shalt.err (!%p1999_p11)
}
  0x8f   : > { %s2003_s28 = scalar_lea.vmem %s2389_s5, 1024  ;;  %s2102_s15 = smov [#allocation12]  }
  0x90   : > { %p2004_p2 = scmp.ne.s32.totalorder %s2389_s5, %s2003_s28  ;;  %s2008_s19 = sshll.u32 %s2102_s15, 4  ;;  %s2009_s19 = int_to_ptr.vmem [resolvable:$false] %s2008_s19 }
  0x91   : > { %s2010_s27 = scalar_lea.vmem %s2009_s19, 2048  ;;  %p2011_p7 = scmp.lt.s32.totalorder %s2389_s5, %s2009_s19 }
  0x92   : > { %p2006_p9 = pnand %p2004_p2, %p2242_p12  ;;  %p2012_p3 = scmp.lt.s32.totalorder %s2010_s27, %s2003_s28 }
  0x94   : > { %p2007_p0 = pneg %p2006_p9  ;;  %p2013_p6 = por %p2012_p3, %p2011_p7 }
  0x96   : > { %p2014_p10 = pnand %p2013_p6, %p2007_p0 }
  0x98   : > { %2017 = shalt.err (!%p2014_p10)
}
  0x99   : > { %1746 = dma.hbm_to_vmem [thread:$0]  (!%p2218_p8), %s2386_s11, 1024, %s2389_s5, %s2288_s17, %s2656_s7, %s2656_s7, %s2655_s25  }
  0x9a   : > { %p2657_p12 = scmp.ne.s32.totalorder %s2653_s12, 0 }
  0x9b   : > { %s429_s13 = sand.u32 (!%p2657_p12), 1, %s2084_s18   ;;  %p2658_p5 = scmp.ne.s32.totalorder (!%p2657_p12), %s2647_s26, 0 }
  0x9c   : > { %427 = sbr.rel (%p2657_p12) target bundleno = 1435 (0x59b), region = 60  ;;  %s1510_s14 = sshll.u32 (!%p2657_p12), %s429_s13, 6 }
  0x9d   : > { %s430_s20 = scalar_lea.sflag (!%p2657_p12), [#allocation5], %s429_s13  ;;  %s2419_s2 = scalar_lea.vmem (!%p2657_p12), [#allocation4], %s1510_s14 }
  0xa3   : > { %2061 = dma.done.wait (%p2658_p5), %s430_s20, 1024  }
  0xa4   : > { %2063 = vsyncadd (%p2658_p5), %s430_s20, 4294966272  ;;  %s438_s30 = sand.u32 1, %s2188_s21   ;;  %s2426_s17 = scalar_lea.vmem [#allocation7], %s1510_s14 }
  0xa5   : > { %s439_s22 = scalar_lea.sflag [#allocation8], %s438_s30 }
  0xa6   : > { %2065 = dma.done.wait (%p2658_p5), %s439_s22, 2048  }
  0xa7   : > { %2067 = vsyncadd (%p2658_p5), %s439_s22, 4294965248  ;;  %s1513_s12 = sshll.u32 %s429_s13, 7  ;;  %s2432_s25 = scalar_lea.vmem [#allocation9], %s1510_s14 }
  0xa8   : > { %s457_s7 = scalar_lea.sflag [#allocation11], %s438_s30  ;;  %s2434_s11 = scalar_lea.vmem [#allocation10], %s1513_s12 }
  0xa9   : > { %2069 = dma.done.wait (%p2658_p5), %s457_s7, 3072  }
  0xaa   : > { %2071 = vsyncadd (%p2658_p5), %s457_s7, 4294964224  ;;  %s2440_s5 = scalar_lea.vmem [#allocation12], %s1510_s14  ;;  %p1515_p8 = scmp.ne.s32.totalorder %s2188_s21, 0 }
  0xab   : > { %v559_v0 = vld [vmem:[%s2618_s0] sm:$0xff] (!%p1515_p8)  ;;  %v561_v1 = vld [vmem:[%s2618_s0 + $0x8] sm:$0xff] (!%p1515_p8) }
  0xac   : > { %526 = sbr.rel (%p1515_p8) target bundleno = 182 (0xb6), region = 84  ;;  %560 = vst [vmem:[#allocation2] sm:$0xff] (!%p1515_p8), %v559_v0  ;;  %562 = vst [vmem:[#allocation2 + $0x8] sm:$0xff] (!%p1515_p8), %v561_v1 }
  0xb3   : > { %570 = vsyncadd [#allocation3], 256 }
  0xb4   : > { %2072 = dma.done.wait [#allocation3], 256 }
  0xb5   : > { %2073 = vsyncadd [#allocation3], 4294967040 }
  0xb6 PF: > { %v1794_v2 = vld [vmem:[%s2419_s2] sm:$0xff]   ;;  %v2103_v3 = vmov 0.0   ;;  %v1795_v4 = vld [vmem:[%s2419_s2 + $0x8] sm:$0xff]   ;;  %vm2104_vm0 = vmmov 0   ;;  %v2105_v5 = vmov 0   ;;  %v1796_v6 = vld [vmem:[%s2419_s2 + $0x10] sm:$0xff]  }
  0xb7   : > { %1625 = vmatprep.subr.bf16.mxu0 %v2103_v3  ;;  %1645 = vmatprep.subr.bf16.mxu1 %v2103_v3  ;;  %v1797_v7 = vld [vmem:[%s2419_s2 + $0x18] sm:$0xff]   ;;  %v922_v8 = vld [vmem:[%s2619_s1] sm:$0xff]  ;;  %v1798_v10 = vld [vmem:[%s2419_s2 + $0x20] sm:$0xff]   ;;  %s2659_s12 = sld [smem:[#allocation23_spill]]  ;;  %vm1092_vm3 = vcmask 130048   ;;  %p1571_p4 = scmp.eq.s32.totalorder %s2188_s21, 2 }
  0xb8   : > { %1626 = vmatpush3.bf16.msra.mxu0 %v1794_v2  ;;  %1641 = vmatprep.mubr.msk.bf16.mxu0 %vm2104_vm0, %v2103_v3  ;;  %v923_v9 = vld [vmem:[%s2619_s1 + $0x8] sm:$0xff]  ;;  %v1799_v11 = vld [vmem:[%s2419_s2 + $0x28] sm:$0xff]   ;;  %v1800_v12 = vld [vmem:[%s2419_s2 + $0x30] sm:$0xff]  }
  0xb9   : > { %1627 = vmatprep.subr.bf16.mxu0 %v2103_v3  ;;  %1792 = vset.pattern.permute.xlu0 %v2105_v5  ;;  %v1801_v13 = vld [vmem:[%s2419_s2 + $0x38] sm:$0xff]   ;;  %v1802_v14 = vld [vmem:[%s2621_s3] sm:$0xff]   ;;  %v1803_v15 = vld [vmem:[%s2426_s17] sm:$0xff]  }
  0xba   : > { %1661 = vmatprep.mubr.msk.bf16.mxu1 %vm2104_vm0, %v2103_v3  ;;  %1793 = vset.pattern.permute.xlu1 %v2105_v5  ;;  %v1804_v16 = vld [vmem:[%s2426_s17 + $0x8] sm:$0xff]   ;;  %v1805_v17 = vld [vmem:[%s2426_s17 + $0x10] sm:$0xff]   ;;  %v1806_v18 = vld [vmem:[%s2426_s17 + $0x18] sm:$0xff]  }
  0xbb   : > { %926 = vperm.xlu0 %1792, %v922_v8   ;;  %1646 = vmatpush3.bf16.msra.mxu1 %v1803_v15  ;;  %v1807_v19 = vld [vmem:[%s2426_s17 + $0x20] sm:$0xff]   ;;  %v1808_v20 = vld [vmem:[%s2426_s17 + $0x28] sm:$0xff]   ;;  %v1809_v21 = vld [vmem:[%s2426_s17 + $0x30] sm:$0xff]  }
  0xbc   : > { %1628 = vmatpush3.bf16.msra.mxu0 %v1795_v4  ;;  %1647 = vmatprep.subr.bf16.mxu1 %v2103_v3  ;;  %v1810_v22 = vld [vmem:[%s2426_s17 + $0x38] sm:$0xff]   ;;  %v1813_v23 = vld [vmem:[%s2434_s11 + $0x4] ss:$8 sps:$4 sm:$0xff]   ;;  %v1078_v24 = vld [vmem:[%s2622_s4] sm:$0xff] }
  0xbd   : > { %1629 = vmatprep.subr.bf16.mxu0 %v2103_v3  ;;  %1081 = vperm.xlu1 %1793, %v1078_v24   ;;  %v1079_v25 = vld [vmem:[%s2622_s4 + $0x8] sm:$0xff]  ;;  %v1811_v40 = vld [vmem:[%s2434_s11] ss:$8 sps:$4 sm:$0xff]   ;;  %v1819_v44 = vld [vmem:[%s2434_s11 + $0x24] ss:$8 sps:$4 sm:$0xff]  }
  0xbe   : > { %v1816_v42 = vld [vmem:[%s2434_s11 + $0x14] ss:$8 sps:$4 sm:$0xff]   ;;  %v1814_v43 = vld [vmem:[%s2434_s11 + $0x10] ss:$8 sps:$4 sm:$0xff]   ;;  %v1817_v45 = vld [vmem:[%s2434_s11 + $0x20] ss:$8 sps:$4 sm:$0xff]  }
  0xbf   : > { %931 = vperm.xlu0 %1792, %v923_v9   ;;  %1648 = vmatpush3.bf16.msra.mxu1 %v1804_v16  ;;  %v1822_v46 = vld [vmem:[%s2434_s11 + $0x34] ss:$8 sps:$4 sm:$0xff]   ;;  %v1820_v47 = vld [vmem:[%s2434_s11 + $0x30] ss:$8 sps:$4 sm:$0xff]   ;;  %v1825_v48 = vld [vmem:[%s2434_s11 + $0x44] ss:$8 sps:$4 sm:$0xff]  }
  0xc0   : > { %1630 = vmatpush3.bf16.msra.mxu0 %v1796_v6  ;;  %1649 = vmatprep.subr.bf16.mxu1 %v2103_v3  ;;  %v1823_v49 = vld [vmem:[%s2434_s11 + $0x40] ss:$8 sps:$4 sm:$0xff]   ;;  %v1828_v50 = vld [vmem:[%s2434_s11 + $0x54] ss:$8 sps:$4 sm:$0xff]   ;;  %v1826_v52 = vld [vmem:[%s2434_s11 + $0x50] ss:$8 sps:$4 sm:$0xff]  }
  0xc1   : > { %1631 = vmatprep.subr.bf16.mxu0 %v2103_v3  ;;  %1084 = vperm.xlu1 %1793, %v1079_v25   ;;  %v1831_v53 = vld [vmem:[%s2434_s11 + $0x64] ss:$8 sps:$4 sm:$0xff]   ;;  %v1829_v54 = vld [vmem:[%s2434_s11 + $0x60] ss:$8 sps:$4 sm:$0xff]   ;;  %v1834_v55 = vld [vmem:[%s2434_s11 + $0x74] ss:$8 sps:$4 sm:$0xff]  }
  0xc2   : > { %v920_v56 = vld [vmem:[#allocation2] sm:$0xff]  ;;  %v921_v58 = vld [vmem:[#allocation2 + $0x8] sm:$0xff]  ;;  %v1835_v63 = vld [vmem:[%s2432_s25] sm:$0xff]  }
  0xc3   : > { %1650 = vmatpush3.bf16.msra.mxu1 %v1805_v17  ;;  %v1832_v59 = vld [vmem:[%s2434_s11 + $0x70] ss:$8 sps:$4 sm:$0xff]   ;;  %v1836_v0 = vld [vmem:[%s2432_s25 + $0x8] sm:$0xff]   ;;  %v1839_v4 = vld [vmem:[%s2432_s25 + $0x20] sm:$0xff]   ;;  %s2660_s11 = sld [smem:[#allocation24_spill]] }
  0xc4   : > { %1632 = vmatpush3.bf16.msra.mxu0 %v1797_v7  ;;  %1651 = vmatprep.subr.bf16.mxu1 %v2103_v3  ;;  %v1837_v1 = vld [vmem:[%s2432_s25 + $0x10] sm:$0xff]   ;;  %v1838_v2 = vld [vmem:[%s2432_s25 + $0x18] sm:$0xff]  }
  0xc5   : > { %1633 = vmatprep.subr.bf16.mxu0 %v2103_v3  ;;  %v1841_v6 = vld [vmem:[%s2432_s25 + $0x30] sm:$0xff]   ;;  %v1842_v7 = vld [vmem:[%s2432_s25 + $0x38] sm:$0xff]  }
  0xc6   : > { %v1843_v8 = vld [vmem:[%s2659_s12] sm:$0xff]  }
  0xc7   : > { %1652 = vmatpush3.bf16.msra.mxu1 %v1806_v18 }
  0xc8   : > { %1634 = vmatpush3.bf16.msra.mxu0 %v1798_v10  ;;  %1653 = vmatprep.subr.bf16.mxu1 %v2103_v3 }
  0xc9   : > { %1635 = vmatprep.subr.bf16.mxu0 %v2103_v3 }
  0xcb   : > { %1654 = vmatpush3.bf16.msra.mxu1 %v1807_v19 }
  0xcc   : > { %1636 = vmatpush3.bf16.msra.mxu0 %v1799_v11  ;;  %1655 = vmatprep.subr.bf16.mxu1 %v2103_v3 }
  0xcd   : > { %1637 = vmatprep.subr.bf16.mxu0 %v2103_v3 }
  0xcf   : > { %1656 = vmatpush3.bf16.msra.mxu1 %v1808_v20 }
  0xd0   : > { %1638 = vmatpush3.bf16.msra.mxu0 %v1800_v12  ;;  %1657 = vmatprep.subr.bf16.mxu1 %v2103_v3 }
  0xd1   : > { %1639 = vmatprep.subr.bf16.mxu0 %v2103_v3 }
  0xd3   : > { %1658 = vmatpush3.bf16.msra.mxu1 %v1809_v21 }
  0xd4   : > { %1640 = vmatpush3.bf16.msra.mxu0 %v1801_v13  ;;  %1659 = vmatprep.subr.bf16.mxu1 %v2103_v3 }
  0xd5   : > { %1665 = vmatprep.subr.bf16.mxu0 %v2103_v3 }
  0xd7   : > { %1642 = vmatmul.mubr.bf16.vlgmr.msra.gmra.mrb[0].mxu0 %v1802_v14  ;;  %1660 = vmatpush3.bf16.msra.mxu1 %v1810_v22  ;;  %v1076_v14 = vlaneseq }
  0xd8   : > { %1681 = vmatprep.mubr.msk.bf16.mxu0 %vm2104_vm0, %v2103_v3  ;;  %1033 = vmatprep.subr.bf16.mxu1 %v1813_v23 }
  0xd9   : > { %1666 = vmatpush3.bf16.msra.mxu0 %v1835_v63  ;;  %v1077_v15 = vand.u32 127, %v1076_v14 }
  0xda   : > { %1667 = vmatprep.subr.bf16.mxu0 %v2103_v3 }
  0xdd   : > { %1668 = vmatpush3.bf16.msra.mxu0 %v1836_v0 }
  0xde   : > { %1669 = vmatprep.subr.bf16.mxu0 %v2103_v3 }
  0xe1   : > { %1670 = vmatpush3.bf16.msra.mxu0 %v1837_v1 }
  0xe2   : > { %1671 = vmatprep.subr.bf16.mxu0 %v2103_v3 }
  0xe5   : > { %1672 = vmatpush3.bf16.msra.mxu0 %v1838_v2 }
  0xe6   : > { %1673 = vmatprep.subr.bf16.mxu0 %v2103_v3 }
  0xe9   : > { %1674 = vmatpush3.bf16.msra.mxu0 %v1839_v4 }
  0xea   : > { %1675 = vmatprep.subr.bf16.mxu0 %v2103_v3 }
 0x13a   : > { %v927_v51 = vpop.permute.xlu0 %926 }
 0x13b   : > { %v934_v60 = vmul.f32 %v927_v51, %v920_v56  ;;  %v1851_v51 = vld [vmem:[%s2440_s5 + $0x38] sm:$0xff]  }
 0x13c   : > { %v1082_v13 = vpop.permute.xlu1 %1081 }
 0x13d   : > { %vm1086_vm1 = vcmp.eq.s32.totalorder %v1077_v15, %v1082_v13 }
 0x13e   : > { %v932_v57 = vpop.permute.xlu0 %931  ;;  %v1088_v20 = vsel %vm1086_vm1, 1.0, %v2103_v3 }
 0x13f   : > { %v935_v61 = vmul.f32 %v932_v57, %v921_v58 }
 0x140   : > { %v1085_v16 = vpop.permute.xlu1 %1084 }
 0x141   : > { %v936_v62 = vpack.c.bf16 %v935_v61, %v934_v60  ;;  %vm1087_vm2 = vcmp.eq.s32.totalorder %v1077_v15, %v1085_v16 }
 0x142   : > { %v1089_v21 = vsel %vm1087_vm2, 1.0, %v2103_v3 }
 0x143   : > { %v1090_v24 = vpack.c.bf16 %v1089_v21, %v1088_v20 }
 0x1aa   : > { %v680_v26 = vpop.f32.mrb[0].mxu0 }
 0x1ab   : > { %v1525_v27 = vmul.f32 -1.442695, %v680_v26  ;;  %v1643_v28 = vpop.f32.mrb[1].mxu0 }
 0x1ac   : > { %v683_v29 = vpop.f32.mrb[2].mxu0 }
 0x1ad   : > { %1852 = vpow2.f32 %v1525_v27  ;;  %v1526_v30 = vmul.f32 -1.442695, %v683_v29  ;;  %v1644_v31 = vpop.f32.mrb[3].mxu0 }
 0x1ae   : > { %v1846_v31 = vld [vmem:[%s2440_s5 + $0x10] sm:$0xff]  }
 0x1af   : > { %1854 = vpow2.f32 %v1526_v30  ;;  %v1845_v30 = vld [vmem:[%s2440_s5 + $0x8] sm:$0xff]  }
 0x1b7   : > { %v1853_v32 = vpop.eup %1852 }
 0x1b8   : > { %v693_v33 = vadd.f32 1.0, %v1853_v32  ;;  %v1847_v32 = vld [vmem:[%s2440_s5 + $0x18] sm:$0xff]  }
 0x1b9   : > { %v1855_v34 = vpop.eup %1854 }
 0x1ba   : > { %1856 = vrcp.f32 %v693_v33  ;;  %v694_v35 = vadd.f32 1.0, %v1855_v34  ;;  %v1848_v33 = vld [vmem:[%s2440_s5 + $0x20] sm:$0xff]   ;;  %v1849_v34 = vld [vmem:[%s2440_s5 + $0x28] sm:$0xff]  }
 0x1bc   : > { %1858 = vrcp.f32 %v694_v35  ;;  %v1850_v35 = vld [vmem:[%s2440_s5 + $0x30] sm:$0xff]  }
 0x1c4   : > { %v1857_v36 = vpop.eup %1856 }
 0x1c5   : > { %v699_v38 = vmul.f32 %v1857_v36, %v680_v26  ;;  %v1142_v36 = vshrl.u32 %v1076_v14, 7 }
 0x1c6   : > { %v1859_v37 = vpop.eup %1858 }
 0x1c7   : > { %v700_v39 = vmul.f32 %v1859_v37, %v683_v29  ;;  %v1844_v29 = vld [vmem:[%s2440_s5] sm:$0xff]   ;;  %v1143_v37 = vadd.s32 8, %v1142_v36 }
 0x1c9   : > { %v701_v41 = vpack.c.bf16 %v700_v39, %v699_v38  ;;  %v1561_v38 = vld [vmem:[%s2660_s11] ss:$0 sm:$0xff] }
 0x1ca   : > { %vm1149_vm4 = vcmp.eq.s32.totalorder %v1142_v36, %v1561_v38  ;;  %vm1150_vm5 = vcmp.eq.s32.totalorder %v1143_v37, %v1561_v38 }
 0x1cb   : > { %1662 = vmatmul.mubr.bf16.vlgmr.msra.gmra.mrb[0].mxu1 %v701_v41 }
 0x1cc   : > { %1034 = vmatpush1.bf16.msra.mxu1 %v1811_v40  ;;  %1065 = vmatprep.mubr.bf16.mxu1 %v2105_v5  ;;  %v1840_v5 = vld [vmem:[%s2432_s25 + $0x28] sm:$0xff]  }
 0x1cd   : > { %1035 = vmatprep.subr.bf16.mxu1 %v1816_v42  ;;  %1676 = vmatpush3.bf16.msra.mxu0 %v1840_v5 }
 0x1ce   : > { %1677 = vmatprep.subr.bf16.mxu0 %v2103_v3 }
 0x1d0   : > { %1036 = vmatpush1.bf16.msra.mxu1 %v1814_v43 }
 0x1d1   : > { %1037 = vmatprep.subr.bf16.mxu1 %v1819_v44  ;;  %1678 = vmatpush3.bf16.msra.mxu0 %v1841_v6 }
 0x1d2   : > { %1679 = vmatprep.subr.bf16.mxu0 %v2103_v3 }
 0x1d4   : > { %1038 = vmatpush1.bf16.msra.mxu1 %v1817_v45 }
 0x1d5   : > { %1039 = vmatprep.subr.bf16.mxu1 %v1822_v46  ;;  %1680 = vmatpush3.bf16.msra.mxu0 %v1842_v7  ;;  %v1151_v46 = vsel %vm1149_vm4, 1.0, %v2103_v3 }
 0x1d6   : > { %1697 = vmatprep.subr.bf16.mxu0 %v2103_v3 }
 0x1d8   : > { %1040 = vmatpush1.bf16.msra.mxu1 %v1820_v47  ;;  %1682 = vmatmul.mubr.bf16.vlgmr.msra.gmra.mrb[4].mxu0 %v1843_v8  ;;  %v1152_v47 = vsel %vm1150_vm5, 1.0, %v2103_v3 }
 0x1d9   : > { %1041 = vmatprep.subr.bf16.mxu1 %v1825_v48  ;;  %1713 = vmatprep.mubr.msk.bf16.mxu0 %vm2104_vm0, %v2103_v3 }
 0x1da   : > { %1698 = vmatpush3.bf16.msra.mxu0 %v1844_v29 }
 0x1db   : > { %1699 = vmatprep.subr.bf16.mxu0 %v2103_v3 }
 0x1dc   : > { %1042 = vmatpush1.bf16.msra.mxu1 %v1823_v49 }
 0x1dd   : > { %1043 = vmatprep.subr.bf16.mxu1 %v1828_v50  ;;  %v1153_v50 = vpack.c.bf16 %v1152_v47, %v1151_v46 }
 0x1de   : > { %1700 = vmatpush3.bf16.msra.mxu0 %v1845_v30 }
 0x1df   : > { %1701 = vmatprep.subr.bf16.mxu0 %v2103_v3 }
 0x1e0   : > { %1044 = vmatpush1.bf16.msra.mxu1 %v1826_v52 }
 0x1e1   : > { %1045 = vmatprep.subr.bf16.mxu1 %v1831_v53 }
 0x1e2   : > { %1702 = vmatpush3.bf16.msra.mxu0 %v1846_v31 }
 0x1e3   : > { %1703 = vmatprep.subr.bf16.mxu0 %v2103_v3 }
 0x1e4   : > { %1046 = vmatpush1.bf16.msra.mxu1 %v1829_v54 }
 0x1e5   : > { %1047 = vmatprep.subr.bf16.mxu1 %v1834_v55 }
 0x1e6   : > { %1704 = vmatpush3.bf16.msra.mxu0 %v1847_v32 }
 0x1e7   : > { %1705 = vmatprep.subr.bf16.mxu0 %v2103_v3 }
 0x1e8   : > { %1048 = vmatpush1.bf16.msra.mxu1 %v1832_v59 }
 0x1e9   : > { %1685 = vmatprep.subr.bf16.mxu1 %v2103_v3 }
 0x1ea   : > { %1706 = vmatpush3.bf16.msra.mxu0 %v1848_v33 }
 0x1eb   : > { %1066 = vmatmul.mubr.bf16.vlgmr.msra.gmra.mrb[4].mxu1 %v936_v62  ;;  %1707 = vmatprep.subr.bf16.mxu0 %v2103_v3 }
 0x1ec   : > { %1687 = vmatprep.mubr.msk.bf16.mxu1 %vm2104_vm0, %v2103_v3 }
 0x1ee   : > { %1708 = vmatpush3.bf16.msra.mxu0 %v1849_v34 }
 0x1ef   : > { %1709 = vmatprep.subr.bf16.mxu0 %v2103_v3 }
 0x1f2   : > { %1710 = vmatpush3.bf16.msra.mxu0 %v1850_v35 }
 0x1f3   : > { %1711 = vmatprep.subr.bf16.mxu0 %v2103_v3 }
 0x1f6   : > { %1712 = vmatpush3.bf16.msra.mxu0 %v1851_v51 }
 0x29e   : > { %v800_v9 = vpop.f32.mrb[0].mxu1 }
 0x29f   : > { %v1663_v10 = vpop.f32.mrb[1].mxu1 }
 0x2a0   : > { %v803_v11 = vpop.f32.mrb[2].mxu1 }
 0x2a1   : > { %v1664_v12 = vpop.f32.mrb[3].mxu1 }
 0x2ab   : > { %v913_v25 = vpop.f32.mrb[4].mxu0 }
 0x2ac   : > { %v1683_v26 = vpop.f32.mrb[5].mxu0 }
 0x2ad   : > { %v916_v27 = vpop.f32.mrb[6].mxu0 }
 0x2ae   : > { %v1684_v28 = vpop.f32.mrb[7].mxu0 }
 0x2be   : > { %v1067_v17 = vpop.f32.mrb[4].mxu1 }
 0x2bf   : > { %v2546_v18 = vpop.f32.mrb[5].mxu1 }
 0x2c0   : > { %v1071_v19 = vpop.f32.mrb[6].mxu1 }
 0x2c1   : > { %v1091_v22 = vpack.c.bf16 %v1071_v19, %v1067_v17  ;;  %v2550_v23 = vpop.f32.mrb[7].mxu1 }
 0x2c3   : > { %1686 = vmatpush3.bf16.msra.mxu1 %v1091_v22 }
 0x2c4   : > { %1691 = vmatprep.subr.bf16.mxu1 %v2103_v3 }
 0x2c6   : > { %1688 = vmatmul.mubr.msk.bf16.vlgmr.msra.gmra.mrb[8].mxu1 %vm1092_vm3, %v1090_v24 }
 0x2c7   : > { %1693 = vmatprep.mubr.msk.bf16.mxu1 %vm2104_vm0, %v2103_v3 }
 0x399   : > { %v1130_v39 = vpop.f32.mrb[8].mxu1 }
 0x39a   : > { %v1137_v40 = vmul.f32 %v1130_v39, %v800_v9  ;;  %v1689_v41 = vpop.f32.mrb[9].mxu1 }
 0x39b   : > { %v1133_v42 = vpop.f32.mrb[10].mxu1 }
 0x39c   : > { %v1139_v43 = vadd.f32 %v1137_v40, %v913_v25  ;;  %v1138_v44 = vmul.f32 %v1133_v42, %v803_v11  ;;  %v1690_v45 = vpop.f32.mrb[11].mxu1 }
 0x39e   : > { %v1140_v48 = vadd.f32 %v1138_v44, %v916_v27 }
 0x3a0   : > { %v1154_v49 = vpack.c.bf16 %v1140_v48, %v1139_v43 }
 0x3a2   : > { %1692 = vmatpush3.bf16.msra.mxu1 %v1154_v49 }
 0x3a5   : > { %1694 = vmatmul.mubr.msk.bf16.vlgmr.msra.gmra.mrb[12].mxu1 %vm1092_vm3, %v1153_v50 }
 0x478   : > { %v1192_v52 = vpop.f32.mrb[12].mxu1 }
 0x479   : > { %v1695_v53 = vpop.f32.mrb[13].mxu1 }
 0x47a   : > { %v1195_v54 = vpop.f32.mrb[14].mxu1 }
 0x47b   : > { %v1199_v55 = vpack.c.bf16 %v1195_v54, %v1192_v52  ;;  %v1696_v56 = vpop.f32.mrb[15].mxu1 }
 0x47d   : > { %1714 = vmatmul.mubr.bf16.vlgmr.msra.gmra.mrb[8].mxu0 %v1199_v55 }
 0x54d   : > { %1310 = sbr.rel (%p1571_p4) target bundleno = 1394 (0x572), region = 122 }
 0x550   : > { %v1298_v57 = vpop.f32.mrb[8].mxu0 }
 0x551   : > { %v1305_v58 = vadd.f32 %v1298_v57, %v2546_v18  ;;  %v1715_v59 = vpop.f32.mrb[9].mxu0 }
 0x552   : > { %v1301_v60 = vpop.f32.mrb[10].mxu0 }
 0x553   : > { %v1306_v3 = vadd.f32 %v1301_v60, %v2550_v23  ;;  %v1716_v61 = vpop.f32.mrb[11].mxu0  ;;  %v1572_v62 = vmul.f32 (!%p1571_p4), -1.442695, %v1305_v58 }
 0x555   : > { %v1573_v63 = vmul.f32 -1.442695, %v1306_v3  ;;  %1860 = vpow2.f32 %v1572_v62 }
 0x557   : > { %1862 = vpow2.f32 %v1573_v63 }
 0x55f   : > { %v1861_v0 = vpop.eup %1860 }
 0x560   : > { %v1317_v2 = vadd.f32 1.0, %v1861_v0 }
 0x561   : > { %v1863_v1 = vpop.eup %1862 }
 0x562   : > { %v1318_v4 = vadd.f32 1.0, %v1863_v1  ;;  %1864 = vrcp.f32 %v1317_v2 }
 0x564   : > { %1866 = vrcp.f32 %v1318_v4 }
 0x56c   : > { %v1865_v5 = vpop.eup %1864 }
 0x56d   : > { %v1323_v7 = vmul.f32 %v1865_v5, %v1305_v58 }
 0x56e   : > { %v1867_v6 = vpop.eup %1866 }
 0x56f   : > { %v1324_v8 = vmul.f32 %v1867_v6, %v1306_v3  ;;  %1325 = vst [vmem:[#allocation2] sm:$0xff] %v1323_v7 }
 0x571   : > { %1326 = vst [vmem:[#allocation2 + $0x8] sm:$0xff] %v1324_v8 }
 0x572 PF: > { %p1574_p13 = scmp.ne.s32.totalorder %s2188_s21, 2 }
 0x573   : > { %1330 = vst [vmem:[#allocation13] sm:$0xff] (!%p1574_p13), %v1305_v58  ;;  %1331 = vst [vmem:[#allocation13 + $0x8] sm:$0xff] (!%p1574_p13), %v1306_v3 }
 0x574   : > { %1329 = sbr.rel (%p1574_p13) target bundleno = 1403 (0x57b), region = 126 }
 0x57b PF: > { %s2106_s5 = smov [#allocation13]  }
 0x57c   : > { %s1338_s23 = sshll.u32 %s2106_s5, 4  ;;  %s1339_s23 = int_to_ptr.vmem [resolvable:$true] %s1338_s23 }
 0x57d   : > { %s2018_s24 = scalar_lea.vmem %s1339_s23, 256  ;;  %p2025_p9 = scmp.lt.s32.totalorder %s1339_s23, %s1339_s23 }
 0x57e   : > { %p2019_p1 = scmp.ne.s32.totalorder %s1339_s23, %s2018_s24  ;;  %p2026_p0 = scmp.lt.s32.totalorder %s2018_s24, %s2018_s24 }
 0x580   : > { %p2020_p11 = pnand %p2019_p1, %p1571_p4  ;;  %p2027_p7 = por %p2026_p0, %p2025_p9 }
 0x582   : > { %p2021_p2 = pneg %p2020_p11 }
 0x584   : > { %p2028_p3 = pnand %p2027_p7, %p2021_p2 }
 0x586   : > { %2031 = shalt.err (!%p2028_p3)
}
 0x587   : > { %s2661_s26 = sld [smem:[#allocation26_spill]] }
 0x58d   : > { %s2032_s28 = scalar_lea.hbm %s2661_s26, 256 }
 0x58e   : > { %p2033_p6 = scmp.ne.s32.totalorder %s2661_s26, %s2032_s28  ;;  %p2038_p5 = scmp.lt.u32.totalorder %s2032_s28, %s2661_s26 }
 0x590   : > { %p2034_p10 = pnand %p2033_p6, %p1571_p4 }
 0x592   : > { %p2035_p12 = pneg %p2034_p10 }
 0x594   : > { %p2040_p8 = pnand %p2038_p5, %p2035_p12 }
 0x596   : > { %2043 = shalt.err (!%p2040_p8)
}
 0x597   : > { %s2107_s14 = smov 128   ;;  %s2108_s20 = smov 8  }
 0x598   : > { %1728 = dma.vmem_to_hbm [thread:$0]  (%p1571_p4), %s1339_s23, 256, %s2661_s26, [#allocation6], %s2107_s14, %s2107_s14, %s2108_s20  }
 0x599   : > { %2075 = dma.done.wait (%p1571_p4), [#allocation6], 256  }
 0x59a   : > { %2077 = vsyncadd (%p1571_p4), [#allocation6], 4294967040 }
 0x59b PF: > { %s2662_s20 = sld [smem:[#allocation21_spill]]  ;;  %s2663_s22 = sld [smem:[#allocation20_spill]] }
 0x59c   : > { %s2664_s19 = sld [smem:[#allocation22_spill]]  ;;  %s2665_s17 = smov %s2084_s18 }
 0x5a1   : > { %p28_p13 = scmp.ge.s32.totalorder %s2662_s20, 5   ;;  %s2666_s18 = smov %s2663_s22 }
 0x5a3   :  { %30 = sbr.rel (!%p28_p13) target bundleno = 13 (0xd), region = 199 }
 0x5aa   :  { %1354 = vsyncpa [#allocation5], 1 }
 0x5ab   :  { %1356 = vsyncpa [#allocation5 + $0x1], 1 }
 0x5ac   :  { %1357 = vsyncpa [#allocation8], 1 }
 0x5ad   :  { %1359 = vsyncpa [#allocation8 + $0x1], 1 }
 0x5ae   :  { %1360 = vsyncpa [#allocation11], 1 }
 0x5af   :  { %1362 = vsyncpa [#allocation11 + $0x1], 1 }
 0x5b0   :  { %1363 = vsyncpa [#allocation6], 1 }
 0x5b1   :  { %1365 = vsyncpa [#allocation6 + $0x1], 1 }
 0x5b2   :  { %1366 = vsyncmov [#allocation3] }
 0x5b5   :  { %s1367_s21 = vpop.sfrf %1366 }
 0x5b6   :  { %p1579_p4 = scmp.ne.s32.totalorder %s1367_s21, 0 }
 0x5b8   :  { %1371 = shalt.err (%p1579_p4)  }

</bundles_post_ra>
